<compile_context>
chip_gen: v5e
topology: v5e:2x2
jax: 0.10.0
libtpu: 0.0.40
codegen_flags: <defaults>
</compile_context>

<pallas_src>
import functools

import jax
import jax.numpy as jnp
from jax.experimental import pallas as pl
from jax.experimental.pallas import tpu as pltpu

C_OUT = 8          # class dim padded 3 -> 8 (narrow, f32 output block)
TM_MAX = 2048      # upper bound on batch tile
VMEM_BUDGET = 24 << 20   # pipeline-buffer budget used to cap the batch tile
VMEM_LIMIT = 32 << 20    # explicit scoped-VMEM limit (safe on v5e/v6e/v7x)


def _round_up(x, m):
    return (x + m - 1) // m * m


def _cdiv(a, b):
    return (a + b - 1) // b


def ensemble_kernel(x_ref, w_ref, b_ref, o_ref):
    # x_ref: [tm, D]   f32 (streamed, double-buffered)
    # w_ref: [D, C_OUT] f32 (resident), b_ref: [1, C_OUT] f32 (resident)
    # o_ref: [tm, C_OUT] f32
    y = jnp.dot(x_ref[...], w_ref[...], preferred_element_type=jnp.float32)
    o_ref[...] = y + b_ref[...]


def fold_ensemble_params(params, c_out=C_OUT):
    """One-time fold of the frozen linear ensemble + fc1 into a single affine map.

    Called at parameter-load time (NOT inside the per-call jit)."""
    w_sum = params["wa"] + params["wb"] + params["wc"]            # [D, F]
    b_sum = params["ba"] + params["bb"] + params["bc"]            # [1, F]
    w_eff = (w_sum @ params["w1"]).astype(jnp.float32)            # [D, C]
    b_eff = (b_sum @ params["w1"] + params["b1"]).astype(jnp.float32)  # [1, C]
    n_classes = w_eff.shape[1]
    pad = c_out - n_classes
    w_eff = jnp.pad(w_eff, ((0, 0), (0, pad)))                    # [D, C_OUT]
    b_eff = jnp.pad(b_eff, ((0, 0), (0, pad)))                    # [1, C_OUT]
    return w_eff, b_eff


@functools.partial(jax.jit, static_argnames=("n_classes", "tm_max"))
def my_ensemble_forward(x, w_eff, b_eff, *, n_classes=3, tm_max=TM_MAX):
    """x: [B, D] f32, (w_eff, b_eff) from fold_ensemble_params. Returns [B, n_classes] f32."""
    B, D = x.shape
    c_out = w_eff.shape[1]

    # --- Batch tile selection ---------------------------------------------
    #  * cap so double-buffered x tiles + (lane-padded) output tiles stay well
    #    under scoped VMEM on every generation (v7x has only 64 MiB physical)
    #  * at least 2 grid steps when B allows, so both v7x TensorCores get work
    per_row = 2 * max(D, 128) * 4 + 2 * 128 * 4   # dbl-buffered x row + out row (f32, lane-padded)
    tm_budget = max(8, (VMEM_BUDGET // per_row) // 8 * 8)
    tm = max(8, min(tm_max, tm_budget, _round_up(_cdiv(B, 2), 8)))
    grid = (_cdiv(B, tm),)

    flops = 2 * B * D * c_out
    bytes_accessed = B * D * 4 + D * c_out * 4 + c_out * 4 + B * c_out * 4

    out = pl.pallas_call(
        ensemble_kernel,
        out_shape=jax.ShapeDtypeStruct((B, c_out), jnp.float32),
        grid_spec=pltpu.PrefetchScalarGridSpec(
            num_scalar_prefetch=0,
            grid=grid,
            in_specs=[
                pl.BlockSpec((tm, D), lambda i: (i, 0)),        # x tile, streamed once
                pl.BlockSpec((D, c_out), lambda i: (0, 0)),     # W_eff, resident
                pl.BlockSpec((1, c_out), lambda i: (0, 0)),     # b_eff, resident
            ],
            out_specs=pl.BlockSpec((tm, c_out), lambda i: (i, 0)),
        ),
        compiler_params=pltpu.CompilerParams(
            dimension_semantics=("parallel",),                  # megacore / 2-TC split
            vmem_limit_bytes=VMEM_LIMIT,                        # v5e default is ~16 MiB
        ),
        cost_estimate=pl.CostEstimate(
            flops=flops, transcendentals=0, bytes_accessed=bytes_accessed),
    )(x, w_eff, b_eff)

    # Strip the class-dim padding back to the module's [B, 3] output.
    return out[:, :n_classes]


def init_params(key, d_in, feat, n_classes=3):
    ks = jax.random.split(key, 8)
    scale_sub = 1.0 / jnp.sqrt(d_in)
    scale_fc = 1.0 / jnp.sqrt(feat)
    return {
        "wa": jax.random.normal(ks[0], (d_in, feat), jnp.float32) * scale_sub,
        "ba": jax.random.normal(ks[1], (1, feat), jnp.float32) * scale_sub,
        "wb": jax.random.normal(ks[2], (d_in, feat), jnp.float32) * scale_sub,
        "bb": jax.random.normal(ks[3], (1, feat), jnp.float32) * scale_sub,
        "wc": jax.random.normal(ks[4], (d_in, feat), jnp.float32) * scale_sub,
        "bc": jax.random.normal(ks[5], (1, feat), jnp.float32) * scale_sub,
        "w1": jax.random.normal(ks[6], (feat, n_classes), jnp.float32) * scale_fc,
        "b1": jax.random.normal(ks[7], (1, n_classes), jnp.float32) * scale_fc,
    }


def reference_forward(x, p):
    """Un-fused f32 reference matching MyEnsemble.forward exactly."""
    out1 = x @ p["wa"] + p["ba"]
    out2 = x @ p["wb"] + p["bb"]
    out3 = x @ p["wc"] + p["bc"]
    out = out1 + out2 + out3
    return out @ p["w1"] + p["b1"]


if __name__ == "__main__":
    key = jax.random.PRNGKey(0)
    k_x, k_p = jax.random.split(key)

    B, D_IN, FEAT = 8, 32, 32   # FEAT == `input` arg of MyEnsemble.__init__
    x = jax.random.normal(k_x, (B, D_IN), jnp.float32)
    params = init_params(k_p, D_IN, FEAT, n_classes=3)

    # One-time fold of the frozen weights (hoisted out of the hot path).
    w_eff, b_eff = fold_ensemble_params(params)

    y = my_ensemble_forward(x, w_eff, b_eff)
    y = jax.block_until_ready(y)

    y_ref = reference_forward(x, params)
    assert y.shape == (B, 3)
    # Relaxed tolerance covers the algebraic re-association and the TPU's
    # default (bf16-pass) matmul precision in the XLA reference.
    assert jnp.allclose(y, y_ref, atol=5e-2, rtol=5e-2), "mismatch vs reference"

    print("KERNEL_OK")
</pallas_src>

<mosaic_0001>
module attributes {stable_mosaic.version = 11 : i64} {
  func.func @ensemble_kernel(%arg0: i32, %arg1: memref<8x32xf32, #tpu.memory_space<vmem>>, %arg2: memref<32x8xf32, #tpu.memory_space<vmem>>, %arg3: memref<1x8xf32, #tpu.memory_space<vmem>>, %arg4: memref<8x8xf32, #tpu.memory_space<vmem>>) attributes {dimension_semantics = [#tpu.dimension_semantics<parallel>], iteration_bounds = array<i64: 1>, scalar_prefetch = 0 : i64, scratch_operands = 0 : i64, tpu.core_type = #tpu.core_type<tc>, window_params = [{transform_indices = @transform_0, window_bounds = array<i64: 8, 32>}, {pipeline_mode = #tpu.pipeline_mode<synchronous>, transform_indices = @transform_1, window_bounds = array<i64: 32, 8>}, {pipeline_mode = #tpu.pipeline_mode<synchronous>, transform_indices = @transform_2, window_bounds = array<i64: 1, 8>}, {transform_indices = @transform_3, window_bounds = array<i64: 8, 8>}]} {
    %c0 = arith.constant 0 : index
    %c0_0 = arith.constant 0 : index
    %0 = vector.load %arg1[%c0, %c0_0] : memref<8x32xf32, #tpu.memory_space<vmem>>, vector<8x32xf32>
    %c0_1 = arith.constant 0 : index
    %c0_2 = arith.constant 0 : index
    %1 = vector.load %arg2[%c0_1, %c0_2] : memref<32x8xf32, #tpu.memory_space<vmem>>, vector<32x8xf32>
    %cst = arith.constant dense<0.000000e+00> : vector<8x8xf32>
    %2 = tpu.matmul %0, %1, %cst {dimension_numbers = #tpu.dot_dimension_numbers<[1], [0], [0], [1], [0, 0, 1, 1], [], []>} : vector<8x32xf32>, vector<32x8xf32>, vector<8x8xf32> -> vector<8x8xf32>
    %c0_3 = arith.constant 0 : index
    %c0_4 = arith.constant 0 : index
    %3 = vector.load %arg3[%c0_3, %c0_4] : memref<1x8xf32, #tpu.memory_space<vmem>>, vector<1x8xf32>
    %4 = vector.broadcast %3 : vector<1x8xf32> to vector<8x8xf32>
    %5 = arith.addf %2, %4 : vector<8x8xf32>
    %c0_5 = arith.constant 0 : index
    %c0_6 = arith.constant 0 : index
    %6 = vector.load %arg4[%c0_5, %c0_6] : memref<8x8xf32, #tpu.memory_space<vmem>>, vector<8x8xf32>
    tpu.vector_store %arg4[%c0_5, %c0_6], %5 {strides = array<i32>} : memref<8x8xf32, #tpu.memory_space<vmem>>, vector<8x8xf32>,
    return
  }
  func.func @transform_0(%arg0: i32) -> (i32, i32) {
    %c0_i32 = arith.constant 0 : i32
    %c0_i32_0 = arith.constant 0 : i32
    return %arg0, %c0_i32 : i32, i32
  }
  func.func @transform_1(%arg0: i32) -> (i32, i32) {
    %c0_i32 = arith.constant 0 : i32
    %c0_i32_0 = arith.constant 0 : i32
    %c0_i32_1 = arith.constant 0 : i32
    return %c0_i32, %c0_i32_0 : i32, i32
  }
  func.func @transform_2(%arg0: i32) -> (i32, i32) {
    %c0_i32 = arith.constant 0 : i32
    %c0_i32_0 = arith.constant 0 : i32
    %c0_i32_1 = arith.constant 0 : i32
    return %c0_i32, %c0_i32_0 : i32, i32
  }
  func.func @transform_3(%arg0: i32) -> (i32, i32) {
    %c0_i32 = arith.constant 0 : i32
    %c0_i32_0 = arith.constant 0 : i32
    return %arg0, %c0_i32 : i32, i32
  }
}

</mosaic_0001>

<bundles_post_ra>
// kernel: my_ensemble_forward.1
= control target key start
LH: loop header
LB: loop body
LE: loop exit
PB: predicated region body
PF: predicated region fallthrough
CT: control target
= control target key end

     0   :  { %vm23_vm0 = vcmask 261120   ;;  %vm47_vm1 = vcmask 64512   ;;  %s96_s1 = inlined_call_operand.vmem [shape: f32[32,8], index: 1, kind: input, shape index: {}]   ;;  %s97_s2 = inlined_call_operand.vmem [shape: f32[1,8], index: 2, kind: input, shape index: {}]   ;;  %s98_s0 = inlined_call_operand.vmem [shape: f32[8,32], index: 0, kind: input, shape index: {}]   ;;  %s99_s3 = inlined_call_operand.vmem [shape: f32[8,8], index: 3, kind: output, shape index: {}]  }
   0x1   :  { %v18_v0 = vld [vmem:[%s96_s1 + $0x18] sm:$0xff]  ;;  %v17_v1 = vld [vmem:[%s96_s1 + $0x10] sm:$0xff]  ;;  %v16_v2 = vld [vmem:[%s96_s1 + $0x8] sm:$0xff] }
   0x2   :  { %39 = vmatpush.msra.mxu0 %v18_v0  ;;  %v15_v3 = vld [vmem:[%s96_s1] sm:$0xff] }
   0x3   :  { %v14_v4 = vld [vmem:[%s98_s0] sm:$0xff] }
   0x4   :  { %40 = vmatpush.msra.mxu0 %v17_v1  ;;  %v54_v5 = vld [vmem:[%s97_s2] ss:$0 sm:$0xff] }
   0x6   :  { %41 = vmatpush.msra.mxu0 %v16_v2 }
   0x8   :  { %42 = vmatpush.msra.mxu0 %v15_v3 }
   0x9   :  { %53 = vmatmul.msk.f32.vlgmr.msra.gmra.mxu0 %vm23_vm0, %v14_v4 }
  0x86   :  { %v44_v6 = vpop.f32.mrf.mxu0 }
  0x87   :  { %v45_v7 = vadd.f32 %v54_v5, %v44_v6 }
  0x89   :  { %48 = vst.msk [vmem:[%s99_s3] sm:$0xff] %vm47_vm1, %v45_v7 }

</bundles_post_ra>
